<compile_context>
chip_gen: v7x
topology: tpu7x:2x2x1
jax: 0.10.0
libtpu: 0.0.40
codegen_flags: <defaults>
</compile_context>

<pallas_src>
import functools

import jax
import jax.numpy as jnp
from jax.experimental import pallas as pl
from jax.experimental.pallas import tpu as pltpu

BN_EPS = 1e-5   # PyTorch BatchNorm1d default
LANE = 128      # TPU lane width: feature dims padded to this for dense vld/vst


def _round_up(n, m):
    return ((n + m - 1) // m) * m


def make_mlp_kernel(n_hidden):
    """Fused MLP kernel for `n_hidden` (Linear->BN->ReLU) blocks + final Linear.

    Ref layout:
      x_ref,
      [w_i, gamma_i, beta_i] * n_hidden,
      w_out, b_out,
      o_ref
    All refs are whole-array VMEM blocks (shapes here are tiny).
    """

    def kernel(*refs):
        x_ref = refs[0]
        idx = 1
        h = x_ref[...]  # f32 activations
        for _ in range(n_hidden):
            w_ref, gamma_ref, beta_ref = refs[idx], refs[idx + 1], refs[idx + 2]
            idx += 3
            # Linear (bias dropped: exactly cancelled by the batch-mean subtraction).
            # bf16 MXU operands, f32 accumulation.
            h = jnp.dot(h.astype(jnp.bfloat16), w_ref[...],
                        preferred_element_type=jnp.float32)
            # Training-mode BatchNorm1d: batch statistics, biased variance. f32 math.
            mean = jnp.mean(h, axis=0, keepdims=True)
            centered = h - mean
            var = jnp.mean(centered * centered, axis=0, keepdims=True)
            # Pre-fold rsqrt(var+eps)*gamma into one (1,H) scale row.
            scale = jax.lax.rsqrt(var + BN_EPS) * gamma_ref[...]
            # ReLU. Padded lanes: h==0 => centered==0 => output==beta(=0) => 0.
            h = jnp.maximum(centered * scale + beta_ref[...], 0.0)
        w_out_ref, b_out_ref, o_ref = refs[idx], refs[idx + 1], refs[idx + 2]
        o_ref[...] = jnp.dot(h.astype(jnp.bfloat16), w_out_ref[...],
                             preferred_element_type=jnp.float32) + b_out_ref[...]

    return kernel


def _vmem_spec():
    return pl.BlockSpec(memory_space=pltpu.MemorySpace.VMEM)


@functools.partial(jax.jit, static_argnames=("output_size",))
def simple_mlp_forward(x, hidden_params, out_w, out_b, *, output_size):
    """x: (batch, input_size) f32; hidden_params: tuple of (w_bf16, gamma, beta)
    with feature dims already padded to multiples of 128; out_w/out_b pre-padded
    to a lane-dense output slab. Returns (batch, output_size) f32."""
    batch = x.shape[0]
    out_pad = out_w.shape[1]

    inputs = [x]
    for (w, gamma, beta) in hidden_params:
        inputs.extend((w, gamma, beta))
    inputs.extend((out_w, out_b))

    # Explicit VMEM budget: resident inputs + output, x2 headroom, clamped so the
    # same code is safe on v7x (64 MiB physical VMEM).
    resident_bytes = sum(int(a.size) * a.dtype.itemsize for a in inputs)
    resident_bytes += batch * out_pad * 4
    vmem_limit = int(min(64 << 20, max(16 << 20, 2 * resident_bytes + (2 << 20))))

    out = pl.pallas_call(
        make_mlp_kernel(len(hidden_params)),
        out_shape=jax.ShapeDtypeStruct((batch, out_pad), jnp.float32),
        in_specs=[_vmem_spec() for _ in inputs],
        out_specs=_vmem_spec(),
        compiler_params=pltpu.CompilerParams(vmem_limit_bytes=vmem_limit),
    )(*inputs)
    # Trim the lane-padded output slab. Callers that can consume the padded slab
    # may skip this slice entirely.
    return out[:, :output_size]


def init_params(key, input_size, hidden_sizes, output_size):
    """PyTorch-style init: Linear ~ U(-1/sqrt(fan_in), 1/sqrt(fan_in)); BN gamma=1, beta=0.

    All feature dims are padded to multiples of 128 here (once), with zero weight
    columns/rows and beta=0 so padded lanes stay exactly zero through BN+ReLU.
    Weights are stored in bf16 (MXU operands); gamma/beta/bias stay f32.
    Hidden-layer Linear biases are omitted (exactly cancelled by train-mode BN).
    """
    hidden_params = []
    fan_in = input_size        # true fan-in (for init bound)
    fan_in_pad = input_size    # kernel-visible (padded) fan-in; x itself is unpadded
    for h in hidden_sizes:
        hp = _round_up(h, LANE)
        key, kw = jax.random.split(key)
        bound = 1.0 / float(fan_in) ** 0.5
        w = jax.random.uniform(kw, (fan_in, h), jnp.float32, -bound, bound)
        w_full = jnp.zeros((fan_in_pad, hp), jnp.float32).at[:fan_in, :h].set(w)
        gamma = jnp.ones((1, hp), jnp.float32)
        beta = jnp.zeros((1, hp), jnp.float32)   # padded betas MUST stay 0
        hidden_params.append((w_full.astype(jnp.bfloat16), gamma, beta))
        fan_in, fan_in_pad = h, hp

    key, kw, kb = jax.random.split(key, 3)
    bound = 1.0 / float(fan_in) ** 0.5
    out_pad = _round_up(output_size, LANE)
    w = jax.random.uniform(kw, (fan_in, output_size), jnp.float32, -bound, bound)
    b = jax.random.uniform(kb, (1, output_size), jnp.float32, -bound, bound)
    out_w = (jnp.zeros((fan_in_pad, out_pad), jnp.float32)
             .at[:fan_in, :output_size].set(w).astype(jnp.bfloat16))
    out_b = jnp.zeros((1, out_pad), jnp.float32).at[:, :output_size].set(b)
    return tuple(hidden_params), out_w, out_b


def reference_forward(x, hidden_params, out_w, out_b, output_size):
    """Pure-JAX f32 reference with identical (padded, bias-less) parameters."""
    h = x
    for (w, gamma, beta) in hidden_params:
        h = h @ w.astype(jnp.float32)
        mean = jnp.mean(h, axis=0, keepdims=True)
        centered = h - mean
        var = jnp.mean(centered * centered, axis=0, keepdims=True)
        h = jnp.maximum(centered * jax.lax.rsqrt(var + BN_EPS) * gamma + beta, 0.0)
    out = h @ out_w.astype(jnp.float32) + out_b
    return out[:, :output_size]


if __name__ == "__main__":
    # Small shapes consistent with the module: MLP over (batch, input_size).
    batch = 8
    input_size = 16
    hidden_sizes = [32, 64]
    output_size = 1

    key = jax.random.PRNGKey(0)
    key, kx = jax.random.split(key)
    x = jax.random.normal(kx, (batch, input_size), dtype=jnp.float32)

    hidden_params, out_w, out_b = init_params(key, input_size, hidden_sizes, output_size)

    out = simple_mlp_forward(x, hidden_params, out_w, out_b, output_size=output_size)
    out = jax.block_until_ready(out)

    assert out.shape == (batch, output_size), out.shape
    assert bool(jnp.all(jnp.isfinite(out)))

    ref = reference_forward(x, hidden_params, out_w, out_b, output_size)
    # bf16 activation rounding at the dot inputs => small deviation vs f32 reference.
    assert bool(jnp.allclose(out, ref, rtol=5e-2, atol=5e-2)), (
        float(jnp.max(jnp.abs(out - ref))))

    print("KERNEL_OK")
</pallas_src>

<mosaic_0001>
module attributes {stable_mosaic.version = 11 : i64} {
  func.func @kernel(%arg0: memref<8x16xf32, #tpu.memory_space<vmem>>, %arg1: memref<16x128xbf16, #tpu.memory_space<vmem>>, %arg2: memref<1x128xf32, #tpu.memory_space<vmem>>, %arg3: memref<1x128xf32, #tpu.memory_space<vmem>>, %arg4: memref<128x128xbf16, #tpu.memory_space<vmem>>, %arg5: memref<1x128xf32, #tpu.memory_space<vmem>>, %arg6: memref<1x128xf32, #tpu.memory_space<vmem>>, %arg7: memref<128x128xbf16, #tpu.memory_space<vmem>>, %arg8: memref<1x128xf32, #tpu.memory_space<vmem>>, %arg9: memref<8x128xf32, #tpu.memory_space<vmem>>) attributes {dimension_semantics = [], scalar_prefetch = 0 : i64, scratch_operands = 0 : i64, tpu.core_type = #tpu.core_type<tc>} {
    %c0 = arith.constant 0 : index
    %c0_0 = arith.constant 0 : index
    %0 = vector.load %arg0[%c0, %c0_0] : memref<8x16xf32, #tpu.memory_space<vmem>>, vector<8x16xf32>
    %1 = arith.truncf %0 : vector<8x16xf32> to vector<8x16xbf16>
    %c0_1 = arith.constant 0 : index
    %c0_2 = arith.constant 0 : index
    %2 = vector.load %arg1[%c0_1, %c0_2] : memref<16x128xbf16, #tpu.memory_space<vmem>>, vector<16x128xbf16>
    %cst = arith.constant dense<0.000000e+00> : vector<8x128xf32>
    %3 = tpu.matmul %1, %2, %cst {dimension_numbers = #tpu.dot_dimension_numbers<[1], [0], [0], [1], [0, 0, 1, 1], [], []>} : vector<8x16xbf16>, vector<16x128xbf16>, vector<8x128xf32> -> vector<8x128xf32>
    %cst_3 = arith.constant dense<0.000000e+00> : vector<128xf32>
    %4 = vector.multi_reduction <add>, %3, %cst_3 [0] : vector<8x128xf32> to vector<128xf32>
    %5 = vector.shape_cast %4 : vector<128xf32> to vector<1x128xf32>
    %cst_4 = arith.constant 8.000000e+00 : f32
    %6 = vector.broadcast %cst_4 : f32 to vector<1x128xf32>
    %7 = arith.divf %5, %6 : vector<1x128xf32>
    %8 = vector.broadcast %7 : vector<1x128xf32> to vector<8x128xf32>
    %9 = arith.subf %3, %8 : vector<8x128xf32>
    %10 = arith.mulf %9, %9 : vector<8x128xf32>
    %cst_5 = arith.constant dense<0.000000e+00> : vector<128xf32>
    %11 = vector.multi_reduction <add>, %10, %cst_5 [0] : vector<8x128xf32> to vector<128xf32>
    %12 = vector.shape_cast %11 : vector<128xf32> to vector<1x128xf32>
    %cst_6 = arith.constant 8.000000e+00 : f32
    %13 = vector.broadcast %cst_6 : f32 to vector<1x128xf32>
    %14 = arith.divf %12, %13 : vector<1x128xf32>
    %cst_7 = arith.constant 9.99999974E-6 : f32
    %15 = vector.broadcast %cst_7 : f32 to vector<1x128xf32>
    %16 = arith.addf %14, %15 : vector<1x128xf32>
    %17 = math.rsqrt %16 : vector<1x128xf32>
    %c0_8 = arith.constant 0 : index
    %c0_9 = arith.constant 0 : index
    %18 = vector.load %arg2[%c0_8, %c0_9] : memref<1x128xf32, #tpu.memory_space<vmem>>, vector<1x128xf32>
    %19 = arith.mulf %17, %18 : vector<1x128xf32>
    %20 = vector.broadcast %19 : vector<1x128xf32> to vector<8x128xf32>
    %21 = arith.mulf %9, %20 : vector<8x128xf32>
    %c0_10 = arith.constant 0 : index
    %c0_11 = arith.constant 0 : index
    %22 = vector.load %arg3[%c0_10, %c0_11] : memref<1x128xf32, #tpu.memory_space<vmem>>, vector<1x128xf32>
    %23 = vector.broadcast %22 : vector<1x128xf32> to vector<8x128xf32>
    %24 = arith.addf %21, %23 : vector<8x128xf32>
    %cst_12 = arith.constant 0.000000e+00 : f32
    %25 = vector.broadcast %cst_12 : f32 to vector<8x128xf32>
    %26 = arith.maximumf %24, %25 : vector<8x128xf32>
    %27 = arith.truncf %26 : vector<8x128xf32> to vector<8x128xbf16>
    %c0_13 = arith.constant 0 : index
    %c0_14 = arith.constant 0 : index
    %28 = vector.load %arg4[%c0_13, %c0_14] : memref<128x128xbf16, #tpu.memory_space<vmem>>, vector<128x128xbf16>
    %cst_15 = arith.constant dense<0.000000e+00> : vector<8x128xf32>
    %29 = tpu.matmul %27, %28, %cst_15 {dimension_numbers = #tpu.dot_dimension_numbers<[1], [0], [0], [1], [0, 0, 1, 1], [], []>} : vector<8x128xbf16>, vector<128x128xbf16>, vector<8x128xf32> -> vector<8x128xf32>
    %cst_16 = arith.constant dense<0.000000e+00> : vector<128xf32>
    %30 = vector.multi_reduction <add>, %29, %cst_16 [0] : vector<8x128xf32> to vector<128xf32>
    %31 = vector.shape_cast %30 : vector<128xf32> to vector<1x128xf32>
    %cst_17 = arith.constant 8.000000e+00 : f32
    %32 = vector.broadcast %cst_17 : f32 to vector<1x128xf32>
    %33 = arith.divf %31, %32 : vector<1x128xf32>
    %34 = vector.broadcast %33 : vector<1x128xf32> to vector<8x128xf32>
    %35 = arith.subf %29, %34 : vector<8x128xf32>
    %36 = arith.mulf %35, %35 : vector<8x128xf32>
    %cst_18 = arith.constant dense<0.000000e+00> : vector<128xf32>
    %37 = vector.multi_reduction <add>, %36, %cst_18 [0] : vector<8x128xf32> to vector<128xf32>
    %38 = vector.shape_cast %37 : vector<128xf32> to vector<1x128xf32>
    %cst_19 = arith.constant 8.000000e+00 : f32
    %39 = vector.broadcast %cst_19 : f32 to vector<1x128xf32>
    %40 = arith.divf %38, %39 : vector<1x128xf32>
    %cst_20 = arith.constant 9.99999974E-6 : f32
    %41 = vector.broadcast %cst_20 : f32 to vector<1x128xf32>
    %42 = arith.addf %40, %41 : vector<1x128xf32>
    %43 = math.rsqrt %42 : vector<1x128xf32>
    %c0_21 = arith.constant 0 : index
    %c0_22 = arith.constant 0 : index
    %44 = vector.load %arg5[%c0_21, %c0_22] : memref<1x128xf32, #tpu.memory_space<vmem>>, vector<1x128xf32>
    %45 = arith.mulf %43, %44 : vector<1x128xf32>
    %46 = vector.broadcast %45 : vector<1x128xf32> to vector<8x128xf32>
    %47 = arith.mulf %35, %46 : vector<8x128xf32>
    %c0_23 = arith.constant 0 : index
    %c0_24 = arith.constant 0 : index
    %48 = vector.load %arg6[%c0_23, %c0_24] : memref<1x128xf32, #tpu.memory_space<vmem>>, vector<1x128xf32>
    %49 = vector.broadcast %48 : vector<1x128xf32> to vector<8x128xf32>
    %50 = arith.addf %47, %49 : vector<8x128xf32>
    %cst_25 = arith.constant 0.000000e+00 : f32
    %51 = vector.broadcast %cst_25 : f32 to vector<8x128xf32>
    %52 = arith.maximumf %50, %51 : vector<8x128xf32>
    %53 = arith.truncf %52 : vector<8x128xf32> to vector<8x128xbf16>
    %c0_26 = arith.constant 0 : index
    %c0_27 = arith.constant 0 : index
    %54 = vector.load %arg7[%c0_26, %c0_27] : memref<128x128xbf16, #tpu.memory_space<vmem>>, vector<128x128xbf16>
    %cst_28 = arith.constant dense<0.000000e+00> : vector<8x128xf32>
    %55 = tpu.matmul %53, %54, %cst_28 {dimension_numbers = #tpu.dot_dimension_numbers<[1], [0], [0], [1], [0, 0, 1, 1], [], []>} : vector<8x128xbf16>, vector<128x128xbf16>, vector<8x128xf32> -> vector<8x128xf32>
    %c0_29 = arith.constant 0 : index
    %c0_30 = arith.constant 0 : index
    %56 = vector.load %arg8[%c0_29, %c0_30] : memref<1x128xf32, #tpu.memory_space<vmem>>, vector<1x128xf32>
    %57 = vector.broadcast %56 : vector<1x128xf32> to vector<8x128xf32>
    %58 = arith.addf %55, %57 : vector<8x128xf32>
    %c0_31 = arith.constant 0 : index
    %c0_32 = arith.constant 0 : index
    %59 = vector.load %arg9[%c0_31, %c0_32] : memref<8x128xf32, #tpu.memory_space<vmem>>, vector<8x128xf32>
    tpu.vector_store %arg9[%c0_31, %c0_32], %58 {strides = array<i32>} : memref<8x128xf32, #tpu.memory_space<vmem>>, vector<8x128xf32>,
    return
  }
}

</mosaic_0001>

<bundles_post_ra>
// kernel: simple_mlp_forward.1
= control target key start
LH: loop header
LB: loop body
LE: loop exit
PB: predicated region body
PF: predicated region fallthrough
CT: control target
= control target key end

     0   :  { %14 = vsyncpa [#allocation3], 0  ;;  %s797_s0 = inlined_call_operand.hbm [shape: f32[8,16], index: 0, kind: input, shape index: {}]   ;;  %s798_s1 = inlined_call_operand.hbm [shape: bf16[16,128], index: 1, kind: input, shape index: {}]   ;;  %s799_s2 = inlined_call_operand.vmem [shape: f32[1,128], index: 2, kind: input, shape index: {}]   ;;  %s800_s3 = inlined_call_operand.vmem [shape: f32[1,128], index: 3, kind: input, shape index: {}]   ;;  %s801_s4 = inlined_call_operand.hbm [shape: bf16[128,128], index: 4, kind: input, shape index: {}]   ;;  %s802_s5 = inlined_call_operand.vmem [shape: f32[1,128], index: 5, kind: input, shape index: {}]   ;;  %s803_s6 = inlined_call_operand.vmem [shape: f32[1,128], index: 6, kind: input, shape index: {}]   ;;  %s804_s7 = inlined_call_operand.hbm [shape: bf16[128,128], index: 7, kind: input, shape index: {}]   ;;  %s805_s8 = inlined_call_operand.vmem [shape: f32[1,128], index: 8, kind: input, shape index: {}]   ;;  %s806_s9 = inlined_call_operand.vmem [shape: f32[8,128], index: 9, kind: output, shape index: {}]  }
   0x1   :  { %15 = vsyncpa [#allocation5], 0 }
   0x2   :  { %16 = vsyncpa [#allocation8], 0  ;;  %s644_s30 = smov [#allocation4]   ;;  %s550_s13 = scalar_lea.hbm %s798_s1, 128 }
   0x3   :  { %s32_s10 = sshll.u32 %s644_s30, 4  ;;  %p551_p0 = scmp.ne.s32.totalorder %s798_s1, %s550_s13  ;;  %s33_s10 = int_to_ptr.vmem [resolvable:$true] %s32_s10 }
   0x4   :  { %p554_p1 = scmp.lt.u32.totalorder %s550_s13, %s798_s1 }
   0x6   :  { %p556_p2 = pnand %p554_p1, %p551_p0 }
   0x8   :  { %559 = shalt.err (!%p556_p2)
}
   0x9   :  { %s560_s18 = scalar_lea.vmem %s33_s10, 128  ;;  %p565_p4 = scmp.lt.s32.totalorder %s33_s10, %s33_s10 }
   0xa   :  { %p561_p3 = scmp.ne.s32.totalorder %s33_s10, %s560_s18  ;;  %p566_p5 = scmp.lt.s32.totalorder %s560_s18, %s560_s18 }
   0xc   :  { %p567_p6 = por %p566_p5, %p565_p4 }
   0xe   :  { %p568_p7 = pnand %p567_p6, %p561_p3 }
  0x10   :  { %571 = shalt.err (!%p568_p7)
}
  0x11   :  { %s645_s19 = smov 64   ;;  %s646_s20 = smov 4  }
  0x12   :  { %38 = dma.hbm_to_vmem [thread:$0]  %s798_s1, 128, %s33_s10, [#allocation5], %s645_s19, %s645_s19, %s646_s20  }
  0x13   :  { %s647_s23 = smov [#allocation2]   ;;  %s648_s25 = smov [#allocation6]  }
  0x14   :  { %s23_s24 = sshll.u32 %s647_s23, 4  ;;  %s48_s26 = sshll.u32 %s648_s25, 4  ;;  %s24_s24 = int_to_ptr.vmem [resolvable:$true] %s23_s24  ;;  %s49_s26 = int_to_ptr.vmem [resolvable:$true] %s48_s26 }
  0x15   :  { %s572_s29 = scalar_lea.hbm %s797_s0, 128 }
  0x16   :  { %p573_p8 = scmp.ne.s32.totalorder %s797_s0, %s572_s29  ;;  %p576_p9 = scmp.lt.u32.totalorder %s572_s29, %s797_s0 }
  0x18   :  { %p578_p10 = pnand %p576_p9, %p573_p8 }
  0x1a   :  { %581 = shalt.err (!%p578_p10)
}
  0x1b   :  { %s582_s1 = scalar_lea.vmem %s24_s24, 128  ;;  %p587_p12 = scmp.lt.s32.totalorder %s24_s24, %s24_s24 }
  0x1c   :  { %p583_p11 = scmp.ne.s32.totalorder %s24_s24, %s582_s1  ;;  %p588_p13 = scmp.lt.s32.totalorder %s582_s1, %s582_s1 }
  0x1e   :  { %p589_p0 = por %p588_p13, %p587_p12 }
  0x20   :  { %p590_p1 = pnand %p589_p0, %p583_p11 }
  0x22   :  { %593 = shalt.err (!%p590_p1)
}
  0x23   :  { %26 = dma.hbm_to_vmem [thread:$0]  %s797_s0, 128, %s24_s24, [#allocation3]  }
  0x24   :  { %s594_s17 = scalar_lea.hbm %s801_s4, 1024 }
  0x25   :  { %p595_p2 = scmp.ne.s32.totalorder %s801_s4, %s594_s17  ;;  %p598_p3 = scmp.lt.u32.totalorder %s594_s17, %s801_s4 }
  0x27   :  { %p600_p4 = pnand %p598_p3, %p595_p2 }
  0x29   :  { %603 = shalt.err (!%p600_p4)
}
  0x2a   :  { %s604_s25 = scalar_lea.vmem %s49_s26, 1024  ;;  %p609_p6 = scmp.lt.s32.totalorder %s49_s26, %s49_s26 }
  0x2b   :  { %p605_p5 = scmp.ne.s32.totalorder %s49_s26, %s604_s25  ;;  %p610_p7 = scmp.lt.s32.totalorder %s604_s25, %s604_s25 }
  0x2d   :  { %p611_p8 = por %p610_p7, %p609_p6 }
  0x2f   :  { %p612_p9 = pnand %p611_p8, %p605_p5 }
  0x31   :  { %615 = shalt.err (!%p612_p9)
}
  0x32   :  { %54 = dma.hbm_to_vmem [thread:$0]  %s801_s4, 1024, %s49_s26, [#allocation5], %s645_s19, %s645_s19, %s646_s20  }
  0x33   :  { %s649_s27 = smov [#allocation7]   ;;  %s616_s11 = scalar_lea.hbm %s804_s7, 1024 }
  0x34   :  { %s64_s28 = sshll.u32 %s649_s27, 4  ;;  %p617_p10 = scmp.ne.s32.totalorder %s804_s7, %s616_s11  ;;  %s65_s28 = int_to_ptr.vmem [resolvable:$true] %s64_s28 }
  0x35   :  { %p620_p11 = scmp.lt.u32.totalorder %s616_s11, %s804_s7 }
  0x37   :  { %p622_p12 = pnand %p620_p11, %p617_p10 }
  0x39   :  { %625 = shalt.err (!%p622_p12)
}
  0x3a   :  { %s626_s14 = scalar_lea.vmem %s65_s28, 1024  ;;  %p631_p0 = scmp.lt.s32.totalorder %s65_s28, %s65_s28 }
  0x3b   :  { %p627_p13 = scmp.ne.s32.totalorder %s65_s28, %s626_s14  ;;  %p632_p1 = scmp.lt.s32.totalorder %s626_s14, %s626_s14 }
  0x3d   :  { %p633_p2 = por %p632_p1, %p631_p0 }
  0x3f   :  { %p634_p3 = pnand %p633_p2, %p627_p13 }
  0x41   :  { %637 = shalt.err (!%p634_p3)
}
  0x42   :  { %70 = dma.hbm_to_vmem [thread:$0]  %s804_s7, 1024, %s65_s28, [#allocation8], %s645_s19, %s645_s19, %s646_s20  }
  0x43   :  { %638 = dma.done.wait [#allocation3], 128  }
  0x44   :  { %639 = vsyncadd [#allocation3], 4294967168 }
  0x45   :  { %640 = dma.done.wait [#allocation5], 1152  }
  0x46   :  { %641 = vsyncadd [#allocation5], 4294966144 }
  0x47   :  { %642 = dma.done.wait [#allocation8], 1024  }
  0x48   :  { %643 = vsyncadd [#allocation8], 4294966272  ;;  %v650_v0 = vmov 0.0   ;;  %vm651_vm0 = vmmov 0   ;;  %v529_v1 = vld [vmem:[#allocation4] sm:$0xff]   ;;  %v86_v2 = vld [vmem:[#allocation2] sm:$0xff]  ;;  %v161_v33 = vlaneseq }
  0x49   :  { %475 = vmatprep.subr.bf16.mxu0 %v650_v0  ;;  %477 = vmatprep.mubr.msk.bf16.mxu0 %vm651_vm0, %v650_v0  ;;  %vm96_vm1 = vcmask 130048   ;;  %v87_v3 = vpack.c.bf16 %v86_v2, %v86_v2  ;;  %v530_v4 = vld [vmem:[#allocation6] sm:$0xff]   ;;  %v531_v5 = vld [vmem:[#allocation6 + $0x8] sm:$0xff]   ;;  %v532_v6 = vld [vmem:[#allocation6 + $0x10] sm:$0xff]  }
  0x4a   :  { %481 = vmatprep.subr.bf16.mxu1 %v650_v0  ;;  %497 = vmatprep.mubr.msk.bf16.mxu1 %vm651_vm0, %v650_v0  ;;  %v533_v7 = vld [vmem:[#allocation6 + $0x18] sm:$0xff]   ;;  %v534_v8 = vld [vmem:[#allocation6 + $0x20] sm:$0xff]   ;;  %v535_v9 = vld [vmem:[#allocation6 + $0x28] sm:$0xff]   ;;  %v162_v34 = vshrl.u32 %v161_v33, 7 }
  0x4b   :  { %476 = vmatpush3.bf16.msra.mxu0 %v529_v1  ;;  %482 = vmatpush3.bf16.msra.mxu1 %v530_v4  ;;  %v536_v10 = vld [vmem:[#allocation6 + $0x30] sm:$0xff]   ;;  %v537_v11 = vld [vmem:[#allocation6 + $0x38] sm:$0xff]   ;;  %v538_v45 = vld [vmem:[#allocation7] sm:$0xff]  }
  0x4c   :  { %501 = vmatprep.subr.bf16.mxu0 %v650_v0  ;;  %483 = vmatprep.subr.bf16.mxu1 %v650_v0  ;;  %v159_v35 = vld [vmem:[%s799_s2] sm:$0x1]  ;;  %v163_v36 = vsub.s32 0, %v162_v34  ;;  %v539_v46 = vld [vmem:[#allocation7 + $0x8] sm:$0xff]   ;;  %v541_v48 = vld [vmem:[#allocation7 + $0x18] sm:$0xff]  }
  0x4d   :  { %v436_v40 = vld [vmem:[%s800_s3] ss:$0 sm:$0xff]  ;;  %v542_v49 = vld [vmem:[#allocation7 + $0x20] sm:$0xff]   ;;  %v543_v50 = vld [vmem:[#allocation7 + $0x28] sm:$0xff]  }
  0x4e   :  { %478 = vmatmul.mubr.msk.bf16.vlgmr.msra.gmra.mrb[0].mxu0 %vm96_vm1, %v87_v3  ;;  %v540_v47 = vld [vmem:[#allocation7 + $0x10] sm:$0xff]   ;;  %v545_v52 = vld [vmem:[#allocation7 + $0x38] sm:$0xff]  }
  0x4f   :  { %517 = vmatprep.mubr.msk.bf16.mxu0 %vm651_vm0, %v650_v0  ;;  %484 = vmatpush3.bf16.msra.mxu1 %v531_v5  ;;  %v544_v51 = vld [vmem:[#allocation7 + $0x30] sm:$0xff]  }
  0x50   :  { %485 = vmatprep.subr.bf16.mxu1 %v650_v0  ;;  %502 = vmatpush3.bf16.msra.mxu0 %v538_v45 }
  0x51   :  { %503 = vmatprep.subr.bf16.mxu0 %v650_v0 }
  0x53   :  { %486 = vmatpush3.bf16.msra.mxu1 %v532_v6 }
  0x54   :  { %487 = vmatprep.subr.bf16.mxu1 %v650_v0  ;;  %504 = vmatpush3.bf16.msra.mxu0 %v539_v46 }
  0x55   :  { %505 = vmatprep.subr.bf16.mxu0 %v650_v0 }
  0x57   :  { %488 = vmatpush3.bf16.msra.mxu1 %v533_v7 }
  0x58   :  { %489 = vmatprep.subr.bf16.mxu1 %v650_v0  ;;  %506 = vmatpush3.bf16.msra.mxu0 %v540_v47 }
  0x59   :  { %507 = vmatprep.subr.bf16.mxu0 %v650_v0 }
  0x5b   :  { %490 = vmatpush3.bf16.msra.mxu1 %v534_v8 }
  0x5c   :  { %491 = vmatprep.subr.bf16.mxu1 %v650_v0  ;;  %508 = vmatpush3.bf16.msra.mxu0 %v541_v48 }
  0x5d   :  { %509 = vmatprep.subr.bf16.mxu0 %v650_v0 }
  0x5f   :  { %492 = vmatpush3.bf16.msra.mxu1 %v535_v9 }
  0x60   :  { %493 = vmatprep.subr.bf16.mxu1 %v650_v0  ;;  %510 = vmatpush3.bf16.msra.mxu0 %v542_v49 }
  0x61   :  { %511 = vmatprep.subr.bf16.mxu0 %v650_v0 }
  0x63   :  { %494 = vmatpush3.bf16.msra.mxu1 %v536_v10  ;;  %v298_v10 = vld [vmem:[%s802_s5] sm:$0x1] }
  0x64   :  { %495 = vmatprep.subr.bf16.mxu1 %v650_v0  ;;  %512 = vmatpush3.bf16.msra.mxu0 %v543_v50 }
  0x65   :  { %513 = vmatprep.subr.bf16.mxu0 %v650_v0 }
  0x67   :  { %496 = vmatpush3.bf16.msra.mxu1 %v537_v11 }
  0x68   :  { %514 = vmatpush3.bf16.msra.mxu0 %v544_v51 }
  0x69   :  { %515 = vmatprep.subr.bf16.mxu0 %v650_v0 }
  0x6c   :  { %516 = vmatpush3.bf16.msra.mxu0 %v545_v52 }
 0x121   :  { %v134_v12 = vpop.f32.mrb[0].mxu0 }
 0x122   :  { %v140_v13 = vrot.slane %v134_v12, 4  ;;  %v479_v14 = vpop.f32.mrb[1].mxu0 }
 0x123   :  { %v137_v15 = vpop.f32.mrb[2].mxu0  ;;  %v445_v14 = vld [vmem:[%s803_s6] ss:$0 sm:$0xff] }
 0x124   :  { %v141_v16 = vadd.f32 %v140_v13, %v134_v12  ;;  %v480_v17 = vpop.f32.mrb[3].mxu0 }
 0x126   :  { %v142_v18 = vrot.slane %v141_v16, 2 }
 0x128   :  { %v143_v19 = vadd.f32 %v142_v18, %v141_v16 }
 0x12a   :  { %v144_v20 = vrot.slane %v143_v19, 1 }
 0x12c   :  { %v145_v21 = vadd.f32 %v144_v20, %v143_v19  ;;  %v446_v19 = vld [vmem:[%s805_s8] ss:$0 sm:$0xff] }
 0x12e   :  { %v147_v22 = vmul.f32 0.125, %v145_v21 }
 0x130   :  { %v148_v23 = vsub.f32 %v134_v12, %v147_v22 }
 0x132   :  { %v149_v24 = vmul.f32 %v148_v23, %v148_v23 }
 0x134   :  { %v150_v25 = vrot.slane %v149_v24, 4 }
 0x136   :  { %v151_v26 = vadd.f32 %v150_v25, %v149_v24 }
 0x138   :  { %v152_v27 = vrot.slane %v151_v26, 2 }
 0x13a   :  { %v153_v28 = vadd.f32 %v152_v27, %v151_v26 }
 0x13c   :  { %v154_v29 = vrot.slane %v153_v28, 1 }
 0x13e   :  { %v155_v30 = vadd.f32 %v154_v29, %v153_v28 }
 0x140   :  { %v156_v31 = vmul.f32 0.125, %v155_v30 }
 0x142   :  { %v157_v32 = vadd.f32 1e-05, %v156_v31 }
 0x144   :  { %546 = vrsqrt.f32 %v157_v32 }
 0x14e   :  { %v547_v37 = vpop.eup %546 }
 0x14f   :  { %v160_v38 = vmul.f32 %v547_v37, %v159_v35 }
 0x151   :  { %v164_v39 = vrot.slane %v160_v38, %v163_v36 }
 0x153   :  { %v165_v41 = vmul.f32 %v164_v39, %v148_v23 }
 0x155   :  { %v173_v42 = vadd.f32 %v436_v40, %v165_v41 }
 0x157   :  { %v174_v43 = vmax.f32 %v173_v42, 0.0 }
 0x159   :  { %v175_v44 = vpack.c.bf16 %v174_v43, %v174_v43 }
 0x15b   :  { %498 = vmatmul.mubr.bf16.vlgmr.msra.gmra.mrb[0].mxu1 %v175_v44 }
 0x22e   :  { %v274_v53 = vpop.f32.mrb[0].mxu1 }
 0x22f   :  { %v280_v54 = vrot.slane %v274_v53, 4  ;;  %v499_v55 = vpop.f32.mrb[1].mxu1 }
 0x230   :  { %v277_v56 = vpop.f32.mrb[2].mxu1 }
 0x231   :  { %v281_v57 = vadd.f32 %v280_v54, %v274_v53  ;;  %v500_v58 = vpop.f32.mrb[3].mxu1 }
 0x233   :  { %v282_v59 = vrot.slane %v281_v57, 2 }
 0x235   :  { %v283_v60 = vadd.f32 %v282_v59, %v281_v57 }
 0x237   :  { %v284_v61 = vrot.slane %v283_v60, 1 }
 0x239   :  { %v285_v62 = vadd.f32 %v284_v61, %v283_v60 }
 0x23b   :  { %v286_v63 = vmul.f32 0.125, %v285_v62 }
 0x23d   :  { %v287_v1 = vsub.f32 %v274_v53, %v286_v63 }
 0x23f   :  { %v288_v2 = vmul.f32 %v287_v1, %v287_v1 }
 0x241   :  { %v289_v3 = vrot.slane %v288_v2, 4 }
 0x243   :  { %v290_v4 = vadd.f32 %v289_v3, %v288_v2 }
 0x245   :  { %v291_v5 = vrot.slane %v290_v4, 2 }
 0x247   :  { %v292_v6 = vadd.f32 %v291_v5, %v290_v4 }
 0x249   :  { %v293_v0 = vrot.slane %v292_v6, 1 }
 0x24b   :  { %v294_v7 = vadd.f32 %v293_v0, %v292_v6 }
 0x24d   :  { %v295_v8 = vmul.f32 0.125, %v294_v7 }
 0x24f   :  { %v296_v9 = vadd.f32 1e-05, %v295_v8 }
 0x251   :  { %548 = vrsqrt.f32 %v296_v9 }
 0x25b   :  { %v549_v11 = vpop.eup %548 }
 0x25c   :  { %v299_v12 = vmul.f32 %v549_v11, %v298_v10 }
 0x25e   :  { %v303_v13 = vrot.slane %v299_v12, %v163_v36 }
 0x260   :  { %v304_v15 = vmul.f32 %v303_v13, %v287_v1 }
 0x262   :  { %v312_v16 = vadd.f32 %v445_v14, %v304_v15 }
 0x264   :  { %v313_v17 = vmax.f32 %v312_v16, 0.0 }
 0x266   :  { %v314_v18 = vpack.c.bf16 %v313_v17, %v313_v17 }
 0x268   :  { %518 = vmatmul.mubr.bf16.vlgmr.msra.gmra.mrb[4].mxu0 %v314_v18 }
 0x33b   :  { %v420_v20 = vpop.f32.mrb[4].mxu0 }
 0x33c   :  { %v421_v21 = vadd.f32 %v446_v19, %v420_v20  ;;  %v519_v22 = vpop.f32.mrb[5].mxu0 }
 0x33d   :  { %v423_v23 = vpop.f32.mrb[6].mxu0 }
 0x33e   :  { %426 = vst [vmem:[%s806_s9] sm:$0xff] %v421_v21  ;;  %v520_v24 = vpop.f32.mrb[7].mxu0 }
 0x33f   :  { %431 = vsyncpa [#allocation3], 1 }
 0x340   :  { %432 = vsyncpa [#allocation5], 1 }
 0x341   :  { %433 = vsyncpa [#allocation8], 1 }

</bundles_post_ra>
